<compile_context>
chip_gen: v5e
topology: v5e:2x2
jax: 0.10.0
libtpu: 0.0.40
codegen_flags: <defaults>
</compile_context>

<pallas_src>
import jax
import jax.numpy as jnp
from jax.experimental import pallas as pl
from jax.experimental.pallas import tpu as pltpu

_LANE = 128
# ~4 MiB per-input tile: 3 arrays x 2 pipeline buffers x 4 MiB = 24 MiB scoped
# VMEM. We set vmem_limit_bytes explicitly so this works on v5e/v6e/v7x without
# relying on the per-generation default scoped-VMEM cap.
_TILE_BYTES = 4 * 1024 * 1024
# Below this, wrapper reshape + per-call overhead dominates; a fused XLA add is
# already at roofline for small residual adds.
_SMALL_FALLBACK_BYTES = 1 << 20


def _add_kernel(a_ref, b_ref, o_ref):
    # Whole-tile elementwise add on the VPU; DMA/store bandwidth is the binding
    # resource, so the body stays trivial. Works for 1-D and 2-D tiles.
    o_ref[...] = a_ref[...] + b_ref[...]


def _compiler_params(block_bytes: int) -> pltpu.CompilerParams:
    # 3 arrays x 2 pipeline buffers x block, +25% headroom, floored/capped so it
    # is valid on every generation (<= 48 MiB keeps clear of v7x's 64 MiB/TC).
    vmem_limit = int(6 * block_bytes * 1.25) + (2 << 20)
    vmem_limit = max(vmem_limit, 16 * 1024 * 1024)
    vmem_limit = min(vmem_limit, 48 * 1024 * 1024)
    return pltpu.CompilerParams(
        dimension_semantics=("parallel",),
        vmem_limit_bytes=vmem_limit,
    )


def _cost_estimate(total: int, itemsize: int) -> pl.CostEstimate:
    # 2 input reads + 1 output write; 1 flop/element, no transcendentals.
    return pl.CostEstimate(
        flops=total, transcendentals=0, bytes_accessed=3 * total * itemsize
    )


def _add_2d(a_flat, b_flat, total, itemsize, dtype):
    """Lane-dense 2-D slab path for total % 128 == 0 (no pad, free reshape)."""
    for W in (2048, 1024, 512, 256, 128):
        if W <= total and total % W == 0:
            break
    rows = total // W
    a2 = a_flat.reshape(rows, W)
    b2 = b_flat.reshape(rows, W)

    # dtype-aware sublane rounding: f32 -> 8 rows, bf16/f16 -> 16, int8/fp8 -> 32.
    sub = 8 * max(1, 4 // itemsize)
    block_rows = max(sub, (_TILE_BYTES // (W * itemsize)) // sub * sub)
    block_rows = min(block_rows, rows)
    if rows > sub:
        # Force >= 2 (balanced) grid steps so both v7x TensorCores stream HBM
        # even when a single tile would cover the whole input; also balances
        # the ragged cdiv last step across cores.
        half = -(-rows // 2)           # ceil(rows / 2)
        half = -(-half // sub) * sub   # round up to a sublane multiple
        block_rows = min(block_rows, half)

    grid = (pl.cdiv(rows, block_rows),)
    block_bytes = block_rows * W * itemsize

    out2 = pl.pallas_call(
        _add_kernel,
        out_shape=jax.ShapeDtypeStruct((rows, W), dtype),
        grid_spec=pltpu.PrefetchScalarGridSpec(
            num_scalar_prefetch=0,
            grid=grid,
            in_specs=[
                pl.BlockSpec((block_rows, W), lambda i: (i, 0)),
                pl.BlockSpec((block_rows, W), lambda i: (i, 0)),
            ],
            out_specs=pl.BlockSpec((block_rows, W), lambda i: (i, 0)),
        ),
        compiler_params=_compiler_params(block_bytes),
        cost_estimate=_cost_estimate(total, itemsize),
    )(a2, b2)
    return out2.reshape(-1)


def _add_1d(a_flat, b_flat, total, itemsize, dtype):
    """Ragged path (total % 128 != 0): 1-D blocks over the un-padded flat
    arrays with a cdiv grid; Pallas masks the partial last block. This removes
    the old jnp.pad(x2) + output-slice round trips (~9N -> 3N bytes of HBM
    traffic)."""
    # Block aligned to full vregs per dtype (8*128*packing elements).
    align = 8 * _LANE * max(1, 4 // itemsize)
    blk = max(align, (_TILE_BYTES // itemsize) // align * align)
    if total <= align:
        blk = total                      # single full-extent block (allowed)
    else:
        half = -(-total // 2)            # ceil(total / 2)
        half = -(-half // align) * align # round up to vreg multiple
        blk = min(blk, half)             # >= 2 grid steps for v7x megacore

    grid = (pl.cdiv(total, blk),)
    block_bytes = blk * itemsize

    out = pl.pallas_call(
        _add_kernel,
        out_shape=jax.ShapeDtypeStruct((total,), dtype),
        grid_spec=pltpu.PrefetchScalarGridSpec(
            num_scalar_prefetch=0,
            grid=grid,
            in_specs=[
                pl.BlockSpec((blk,), lambda i: (i,)),
                pl.BlockSpec((blk,), lambda i: (i,)),
            ],
            out_specs=pl.BlockSpec((blk,), lambda i: (i,)),
        ),
        compiler_params=_compiler_params(block_bytes),
        cost_estimate=_cost_estimate(total, itemsize),
    )(a_flat, b_flat)
    return out


def pallas_add(a: jax.Array, b: jax.Array, *, force_pallas: bool = False) -> jax.Array:
    """Elementwise add via a Pallas TPU kernel. Mirrors FloatFunctional.add."""
    assert a.shape == b.shape, "Add expects identical shapes (no broadcasting)"
    assert a.dtype == b.dtype

    orig_shape = a.shape
    total = a.size
    itemsize = jnp.dtype(a.dtype).itemsize

    if total == 0:
        return a + b
    if not force_pallas and total * itemsize < _SMALL_FALLBACK_BYTES:
        # Small residual adds: plain XLA add avoids reshape/call overhead and
        # is already at the HBM roofline.
        return a + b

    a_flat = jnp.ravel(a)
    b_flat = jnp.ravel(b)

    if total % _LANE == 0:
        out_flat = _add_2d(a_flat, b_flat, total, itemsize, a.dtype)
    else:
        out_flat = _add_1d(a_flat, b_flat, total, itemsize, a.dtype)

    return out_flat.reshape(orig_shape)


if __name__ == "__main__":
    key = jax.random.PRNGKey(0)
    ka, kb, kc, kd, ke, kf = jax.random.split(key, 6)

    # 1) Small NCHW residual-add shape from the module spec.
    #    Forced through the Pallas path so the 2-D kernel itself is exercised.
    a0 = jax.random.normal(ka, (2, 4, 16, 16), dtype=jnp.float32)
    b0 = jax.random.normal(kb, (2, 4, 16, 16), dtype=jnp.float32)
    out0 = pallas_add(a0, b0, force_pallas=True)
    jax.block_until_ready(out0)
    assert out0.shape == a0.shape and out0.dtype == a0.dtype
    assert jnp.allclose(out0, a0 + b0), "Mismatch vs reference add (small)"

    # 2) Larger input: default dispatch -> Pallas, 2-step balanced parallel
    #    grid with lane-dense tiles (exercises pipelining + v7x split).
    a1 = jax.random.normal(kc, (4, 64, 64, 64), dtype=jnp.float32)
    b1 = jax.random.normal(kd, (4, 64, 64, 64), dtype=jnp.float32)
    out1 = pallas_add(a1, b1)
    jax.block_until_ready(out1)
    assert jnp.allclose(out1, a1 + b1), "Mismatch vs reference add (large)"

    # 3) Awkward element count (not a multiple of 128): pad-free 1-D path with
    #    a masked ragged last block.
    a2 = jax.random.normal(ke, (2, 3, 15, 17), dtype=jnp.float32)
    b2 = jax.random.normal(kf, (2, 3, 15, 17), dtype=jnp.float32)
    out2 = pallas_add(a2, b2, force_pallas=True)
    jax.block_until_ready(out2)
    assert out2.shape == a2.shape and out2.dtype == a2.dtype
    assert jnp.allclose(out2, a2 + b2), "Mismatch vs reference add (ragged)"

    print("KERNEL_OK")
</pallas_src>

<mosaic_0001>
module attributes {stable_mosaic.version = 11 : i64} {
  func.func @_add_kernel(%arg0: i32, %arg1: memref<1x2048xf32, #tpu.memory_space<vmem>>, %arg2: memref<1x2048xf32, #tpu.memory_space<vmem>>, %arg3: memref<1x2048xf32, #tpu.memory_space<vmem>>) attributes {dimension_semantics = [#tpu.dimension_semantics<parallel>], iteration_bounds = array<i64: 1>, scalar_prefetch = 0 : i64, scratch_operands = 0 : i64, tpu.core_type = #tpu.core_type<tc>, window_params = [{transform_indices = @transform_0, window_bounds = array<i64: 1, 2048>}, {transform_indices = @transform_1, window_bounds = array<i64: 1, 2048>}, {transform_indices = @transform_2, window_bounds = array<i64: 1, 2048>}]} {
    %c0 = arith.constant 0 : index
    %c0_0 = arith.constant 0 : index
    %0 = vector.load %arg1[%c0, %c0_0] : memref<1x2048xf32, #tpu.memory_space<vmem>>, vector<1x2048xf32>
    %c0_1 = arith.constant 0 : index
    %c0_2 = arith.constant 0 : index
    %1 = vector.load %arg2[%c0_1, %c0_2] : memref<1x2048xf32, #tpu.memory_space<vmem>>, vector<1x2048xf32>
    %2 = arith.addf %0, %1 : vector<1x2048xf32>
    %c0_3 = arith.constant 0 : index
    %c0_4 = arith.constant 0 : index
    %3 = vector.load %arg3[%c0_3, %c0_4] : memref<1x2048xf32, #tpu.memory_space<vmem>>, vector<1x2048xf32>
    tpu.vector_store %arg3[%c0_3, %c0_4], %2 {strides = array<i32>} : memref<1x2048xf32, #tpu.memory_space<vmem>>, vector<1x2048xf32>,
    return
  }
  func.func @transform_0(%arg0: i32) -> (i32, i32) {
    %c0_i32 = arith.constant 0 : i32
    %c0_i32_0 = arith.constant 0 : i32
    return %arg0, %c0_i32 : i32, i32
  }
  func.func @transform_1(%arg0: i32) -> (i32, i32) {
    %c0_i32 = arith.constant 0 : i32
    %c0_i32_0 = arith.constant 0 : i32
    return %arg0, %c0_i32 : i32, i32
  }
  func.func @transform_2(%arg0: i32) -> (i32, i32) {
    %c0_i32 = arith.constant 0 : i32
    %c0_i32_0 = arith.constant 0 : i32
    return %arg0, %c0_i32 : i32, i32
  }
}

</mosaic_0001>

<bundles_post_ra>
// kernel: tpu_custom_call.1
= control target key start
LH: loop header
LB: loop body
LE: loop exit
PB: predicated region body
PF: predicated region fallthrough
CT: control target
= control target key end

     0   :  { %7 = vsyncpa [#allocation3], 0  ;;  %s174_s0 = inlined_call_operand.hbm [shape: f32[1,2048], index: 0, kind: input, shape index: {}]   ;;  %s175_s1 = inlined_call_operand.hbm [shape: f32[1,2048], index: 1, kind: input, shape index: {}]   ;;  %s176_s2 = inlined_call_operand.hbm [shape: f32[1,2048], index: 2, kind: output, shape index: {}]  }
   0x1   :  { %8 = vsyncpa [#allocation6], 0 }
   0x2   :  { %9 = vsyncpa [#allocation4], 0  ;;  %s15_s11 = sshll.u32 %s174_s0, 4  ;;  %s147_s12 = smov [#allocation2]   ;;  %s16_s11 = int_to_ptr.hbm [resolvable:$true] %s15_s11 }
   0x3   :  { %s17_s13 = sshll.u32 %s147_s12, 4  ;;  %s26_s16 = sshll.u32 %s175_s1, 4  ;;  %s18_s13 = int_to_ptr.vmem [resolvable:$true] %s17_s13  ;;  %s27_s16 = int_to_ptr.hbm [resolvable:$true] %s26_s16 }
   0x4   :  { %20 = dma.hbm_to_vmem [thread:$0]  %s16_s11, 256, %s18_s13, [#allocation3]  }
   0x5   :  { %s148_s17 = smov [#allocation5]  }
   0x6   :  { %s28_s18 = sshll.u32 %s148_s17, 4  ;;  %s29_s18 = int_to_ptr.vmem [resolvable:$true] %s28_s18 }
   0x7   :  { %31 = dma.hbm_to_vmem [thread:$0]  %s27_s16, 256, %s29_s18, [#allocation6]  }
   0x8   :  { %141 = dma.done.wait [#allocation3], 256  }
   0x9   :  { %142 = vsyncadd [#allocation3], 4294967040 }
   0xa   :  { %143 = dma.done.wait [#allocation6], 256  }
   0xb   :  { %144 = vsyncadd [#allocation6], 4294967040  ;;  %s149_s19 = smov [#allocation7]   ;;  %s55_s22 = sshll.u32 %s176_s2, 4  ;;  %v40_v0 = vld [vmem:[#allocation2] sm:$0xff]  ;;  %v42_v1 = vld [vmem:[#allocation5] sm:$0xff]  ;;  %s56_s22 = int_to_ptr.hbm [resolvable:$true] %s55_s22 }
   0xc   :  { %s53_s0 = sshll.u32 %s149_s19, 4  ;;  %v41_v2 = vld [vmem:[#allocation2 + $0x8] sm:$0xff]  ;;  %v44_v3 = vadd.f32 %v42_v1, %v40_v0  ;;  %v43_v4 = vld [vmem:[#allocation5 + $0x8] sm:$0xff]  ;;  %s54_s0 = int_to_ptr.vmem [resolvable:$true] %s53_s0 }
   0xd   :  { %v45_v5 = vadd.f32 %v43_v4, %v41_v2 }
   0xe   :  { %46 = vst [vmem:[#allocation7] sm:$0xff] %v44_v3 }
   0xf   :  { %47 = vst [vmem:[#allocation7 + $0x8] sm:$0xff] %v45_v5 }
  0x10   :  { %58 = dma.vmem_to_hbm [thread:$0]  %s54_s0, 256, %s56_s22, [#allocation4]  }
  0x11   :  { %145 = dma.done.wait [#allocation4], 256  }
  0x12   :  { %146 = vsyncadd [#allocation4], 4294967040 }
  0x13   :  { %63 = vsyncpa [#allocation3], 1 }
  0x14   :  { %64 = vsyncpa [#allocation6], 1 }
  0x15   :  { %65 = vsyncpa [#allocation4], 1 }

</bundles_post_ra>
